<compile_context>
chip_gen: v7x
topology: tpu7x:2x2x1
jax: 0.10.0
libtpu: 0.0.40
codegen_flags: <defaults>
</compile_context>

<pallas_src>
import functools

import jax
import jax.numpy as jnp
from jax.experimental import pallas as pl
from jax.experimental.pallas import tpu as pltpu

LANE = 128
SUB = 8
CHUNK = 1024                              # rows per inner compute chunk
INPUT_VMEM_BUDGET = 20 * 1024 * 1024      # double-buffered input streams
VMEM_LIMIT_BYTES = 32 * 1024 * 1024       # explicit scoped-VMEM limit


@functools.lru_cache(maxsize=1)
def _num_tensorcores():
    """Best-effort TensorCore count per device; defaults to 1."""
    n = None
    try:
        info = pltpu.get_tpu_info()
        for name in ("num_cores", "core_count", "num_tensorcores",
                     "tensorcore_count", "num_cores_per_chip"):
            v = getattr(info, name, None)
            if isinstance(v, int) and v >= 1:
                n = v
                break
    except Exception:
        n = None
    if n is None:
        try:
            v = getattr(jax.devices()[0], "num_cores", None)
            if isinstance(v, int) and v >= 1:
                n = v
        except Exception:
            n = None
    if n is None:
        n = 1
    return max(1, min(int(n), 4))


def _focal_kernel(*refs, gamma, ignore_index, eps, rows, rpb, chunk, nbpc,
                  mode, hw, n_classes):
    if mode == "full":
        x_ref, t_ref, w_ref, sum_ref, cnt_ref = refs
        wtbl_ref = None
    elif mode == "per_class":
        x_ref, t_ref, wtbl_ref, sum_ref, cnt_ref = refs
        w_ref = None
    else:
        x_ref, t_ref, sum_ref, cnt_ref = refs
        w_ref = wtbl_ref = None

    c = pl.program_id(0)   # core split ("parallel")
    j = pl.program_id(1)   # row-block within this core's share ("arbitrary")

    # Per-core accumulators live in the output blocks (block index depends
    # only on c, so they stay resident across the whole arbitrary axis).
    @pl.when(j == 0)
    def _():
        sum_ref[...] = jnp.zeros_like(sum_ref)
        cnt_ref[...] = jnp.zeros_like(cnt_ref)

    block_row0 = (c * nbpc + j) * rpb
    gam = float(gamma)

    # Hoist the tiny per-class weight table reads out of the chunk loop.
    if mode == "per_class":
        w_vals = [wtbl_ref[k] for k in range(n_classes)]

    def body(i, carry):
        r0 = pl.multiple_of(i * chunk, chunk)
        x = x_ref[pl.ds(r0, chunk), :].astype(jnp.float32)
        t = t_ref[pl.ds(r0, chunk), :].astype(jnp.float32)

        # Logical global row index: masks the partial last block and (when
        # the core split is uneven) the clamped, fully-out-of-range block.
        row_ids = (jax.lax.broadcasted_iota(jnp.int32, (chunk, 1), 0)
                   + (block_row0 + i * chunk))
        in_bounds = row_ids < rows
        # Float equality is exact for integer labels < 2^24 (255 included).
        valid = in_bounds & (t != jnp.float32(ignore_index))

        # Single-EUP sigmoid: sigmoid(x) == 0.5*(1 + tanh(x/2)).
        p = 0.5 * (jnp.tanh(0.5 * x) + 1.0)
        p = jnp.clip(p, eps, 1.0 - eps)
        tcl = jnp.clip(t, eps, 1.0 - eps)
        pt = (1.0 - tcl) * (1.0 - p) + tcl * p
        one_m = 1.0 - pt

        # Integer-gamma specialization: plain multiplies instead of pow.
        if gam == 2.0:
            focal = one_m * one_m
        elif gam == 1.0:
            focal = one_m
        elif gam.is_integer() and 1.0 < gam <= 4.0:
            focal = one_m
            for _ in range(int(gam) - 1):
                focal = focal * one_m
        else:
            focal = one_m ** gam

        loss = -focal * jnp.log(pt)

        if mode == "full":
            loss = loss * w_ref[pl.ds(r0, chunk), :].astype(jnp.float32)
        elif mode == "per_class":
            lane_ids = jax.lax.broadcasted_iota(jnp.int32, (1, LANE), 1)
            flat = row_ids * LANE + lane_ids              # global flat index
            chan = (flat // hw) % n_classes
            wsel = jnp.zeros((chunk, LANE), jnp.float32) + w_vals[0]
            for k in range(1, n_classes):
                wsel = jnp.where(chan == k, w_vals[k], wsel)
            loss = loss * wsel

        # Keep the SELECT on the potentially-NaN operand (garbage rows of a
        # clamped / partial block) -- do not fold into a multiply.
        loss = jnp.where(valid, loss, 0.0)
        cnt = valid.astype(jnp.float32)

        # (chunk,128) -> (chunk/8, 8, 128): a no-op relayout; the axis-0 sum
        # is pure vreg-wise VPU adds into the full-vreg accumulator.
        sum_ref[...] += loss.reshape(chunk // 8, SUB, LANE).sum(axis=0)[None]
        cnt_ref[...] += cnt.reshape(chunk // 8, SUB, LANE).sum(axis=0)[None]
        return carry

    jax.lax.fori_loop(0, rpb // chunk, body, 0)


def focal_loss_2d(outputs, targets, weights=1.0, *,
                  gamma=2.0, ignore_index=255, eps=1e-6):
    """Matches FocalLoss2d.forward: mean focal loss over non-ignored elems."""
    # ---- weights handling -------------------------------------------------
    scalar_weight = 1.0
    mode = "none"
    w_full = None
    w_tbl = None
    hw = 1
    n_classes = 1
    if weights is None or isinstance(weights, (int, float)):
        scalar_weight = 1.0 if weights is None else float(weights)
    else:
        w = jnp.asarray(weights)
        if w.ndim == 0:
            scalar_weight = w
        elif (outputs.ndim == 4
              and w.size == outputs.shape[1]
              and w.size <= 64
              and outputs.size < 2 ** 31
              and w.shape in ((outputs.shape[1],),
                              (1, outputs.shape[1], 1, 1))):
            # Per-class weights: tiny SMEM table, no HBM weight stream.
            mode = "per_class"
            w_tbl = w.reshape(-1).astype(jnp.float32)
            n_classes = int(outputs.shape[1])
            hw = int(outputs.shape[2] * outputs.shape[3])
        elif tuple(w.shape) == tuple(outputs.shape):
            mode = "full"
            w_full = w
        else:
            # TODO(synk): general-broadcast weights still stream a full-size
            # array; only scalar / per-class / same-shape avoid it.
            mode = "full"
            w_full = jnp.broadcast_to(w, outputs.shape)

    # ---- flatten to a lane-dense (rows, 128) slab, rows % 8 == 0 ----------
    n = outputs.size
    pad_to = SUB * LANE
    rem = n % pad_to
    x_flat = outputs.reshape(-1)
    t_flat = targets.reshape(-1)
    w_flat = w_full.reshape(-1) if mode == "full" else None
    if rem:
        pad = pad_to - rem
        x_flat = jnp.pad(x_flat, (0, pad))
        t_flat = jnp.pad(t_flat, (0, pad), constant_values=ignore_index)
        if mode == "full":
            w_flat = jnp.pad(w_flat, (0, pad))
    x2 = x_flat.reshape(-1, LANE)
    t2 = t_flat.reshape(-1, LANE)
    w2 = w_flat.reshape(-1, LANE) if mode == "full" else None
    rows = x2.shape[0]                                   # multiple of 8

    # ---- block sizing ------------------------------------------------------
    ncores = _num_tensorcores()
    stream_bytes_per_row = LANE * (x2.dtype.itemsize + t2.dtype.itemsize
                                   + (w2.dtype.itemsize if mode == "full" else 0))
    rpb_cap = max(SUB, INPUT_VMEM_BUDGET // (2 * stream_bytes_per_row))
    rows_per_core = -(-rows // ncores)
    rpb = min(rpb_cap, rows_per_core, rows)
    if rpb >= CHUNK:
        rpb = (rpb // CHUNK) * CHUNK
        chunk = CHUNK
    else:
        rpb = max(SUB, (rpb // SUB) * SUB)
        chunk = rpb

    nblocks = -(-rows // rpb)
    num_cores = max(1, min(ncores, nblocks))
    nbpc = -(-nblocks // num_cores)
    needs_clamp = num_cores * nbpc > nblocks             # static

    def in_map(c, j):
        b = c * nbpc + j
        if needs_clamp:
            # Re-read the last real block for the (at most num_cores-1)
            # out-of-range steps; the kernel masks them out entirely.
            b = jnp.minimum(b, nblocks - 1)
        return (b, 0)

    in_specs = [pl.BlockSpec((rpb, LANE), in_map),
                pl.BlockSpec((rpb, LANE), in_map)]
    args = [x2, t2]
    if mode == "full":
        in_specs.append(pl.BlockSpec((rpb, LANE), in_map))
        args.append(w2)
    elif mode == "per_class":
        in_specs.append(pl.BlockSpec(memory_space=pltpu.MemorySpace.SMEM))
        args.append(w_tbl)

    kernel = functools.partial(
        _focal_kernel, gamma=float(gamma), ignore_index=float(ignore_index),
        eps=float(eps), rows=rows, rpb=rpb, chunk=chunk, nbpc=nbpc,
        mode=mode, hw=hw, n_classes=n_classes)

    out_map = lambda c, j: (c, 0, 0)
    sums, cnts = pl.pallas_call(
        kernel,
        out_shape=(jax.ShapeDtypeStruct((num_cores, SUB, LANE), jnp.float32),
                   jax.ShapeDtypeStruct((num_cores, SUB, LANE), jnp.float32)),
        grid=(num_cores, nbpc),
        in_specs=in_specs,
        out_specs=(pl.BlockSpec((1, SUB, LANE), out_map),
                   pl.BlockSpec((1, SUB, LANE), out_map)),
        compiler_params=pltpu.CompilerParams(
            dimension_semantics=("parallel", "arbitrary"),
            vmem_limit_bytes=VMEM_LIMIT_BYTES),
    )(*args)

    total = jnp.sum(sums)
    count = jnp.sum(cnts)
    # count == 0 -> NaN, matching torch .mean() over an empty tensor.
    return (total / count) * scalar_weight


def _focal_loss_ref(outputs, targets, weights=1.0,
                    gamma=2.0, ignore_index=255, eps=1e-6):
    """Pure-JAX reference mirroring the PyTorch module (masked mean)."""
    x = outputs.reshape(-1).astype(jnp.float32)
    t = targets.reshape(-1).astype(jnp.float32)
    if weights is None or isinstance(weights, (int, float)):
        w = jnp.full_like(x, 1.0 if weights is None else float(weights))
    else:
        w = jnp.broadcast_to(jnp.asarray(weights), outputs.shape
                             ).reshape(-1).astype(jnp.float32)
    valid = t != float(ignore_index)
    p = jnp.clip(jax.nn.sigmoid(x), eps, 1.0 - eps)
    tc = jnp.clip(t, eps, 1.0 - eps)
    pt = (1.0 - tc) * (1.0 - p) + tc * p
    loss = -((1.0 - pt) ** gamma) * jnp.log(pt) * w
    return jnp.sum(jnp.where(valid, loss, 0.0)) / jnp.sum(valid.astype(jnp.float32))


if __name__ == "__main__":
    key = jax.random.PRNGKey(0)
    k1, k2, k3, k4, k5, k6, k7, k8 = jax.random.split(key, 8)

    # --- test 1: NCHW f32 logits, f32 targets with ignore pixels, full-shape
    #             weights array.
    N, C, H, W = 2, 4, 16, 16
    outputs = jax.random.normal(k1, (N, C, H, W), dtype=jnp.float32)
    targets = jax.random.randint(k2, (N, C, H, W), 0, 2).astype(jnp.float32)
    ignore_mask = jax.random.uniform(k3, (N, C, H, W)) < 0.1
    targets = jnp.where(ignore_mask, 255.0, targets)
    weights = jax.random.uniform(k4, (N, C, H, W), minval=0.5, maxval=1.5)

    loss1 = focal_loss_2d(outputs, targets, weights)
    jax.block_until_ready(loss1)
    ref1 = _focal_loss_ref(outputs, targets, weights)
    assert jnp.allclose(loss1, ref1, rtol=2e-5, atol=2e-6), (loss1, ref1)

    # --- test 2: native narrow dtypes (bf16 logits, int32 targets), default
    #             scalar weight, numel not a multiple of 1024 (pad path).
    N2, C2, H2, W2 = 1, 3, 7, 11
    out_bf16 = jax.random.normal(k5, (N2, C2, H2, W2), dtype=jnp.float32
                                 ).astype(jnp.bfloat16)
    tgt_int = jax.random.randint(k6, (N2, C2, H2, W2), 0, 2).astype(jnp.int32)
    ign2 = jax.random.uniform(k7, (N2, C2, H2, W2)) < 0.1
    tgt_int = jnp.where(ign2, 255, tgt_int)

    loss2 = focal_loss_2d(out_bf16, tgt_int)           # default weights=1.0
    jax.block_until_ready(loss2)
    ref2 = _focal_loss_ref(out_bf16, tgt_int)
    assert jnp.allclose(loss2, ref2, rtol=2e-5, atol=2e-6), (loss2, ref2)

    # --- test 3: per-class (C,) weights -> SMEM table path (no HBM weight
    #             stream), f32 logits / targets with ignore pixels.
    w_cls = jax.random.uniform(k8, (C,), minval=0.5, maxval=2.0)
    loss3 = focal_loss_2d(outputs, targets, w_cls)
    jax.block_until_ready(loss3)
    ref3 = _focal_loss_ref(
        outputs, targets,
        jnp.broadcast_to(w_cls[None, :, None, None], outputs.shape))
    assert jnp.allclose(loss3, ref3, rtol=2e-5, atol=2e-6), (loss3, ref3)

    print("KERNEL_OK")
</pallas_src>

<mosaic_0001>
module attributes {stable_mosaic.version = 11 : i64} {
  func.func @_focal_kernel(%arg0: i32, %arg1: i32, %arg2: memref<16x128xf32, #tpu.memory_space<vmem>>, %arg3: memref<16x128xf32, #tpu.memory_space<vmem>>, %arg4: memref<16x128xf32, #tpu.memory_space<vmem>>, %arg5: memref<1x8x128xf32, #tpu.memory_space<vmem>>, %arg6: memref<1x8x128xf32, #tpu.memory_space<vmem>>) attributes {dimension_semantics = [#tpu.dimension_semantics<parallel>, #tpu.dimension_semantics<arbitrary>], iteration_bounds = array<i64: 1, 1>, scalar_prefetch = 0 : i64, scratch_operands = 0 : i64, tpu.core_type = #tpu.core_type<tc>, window_params = [{transform_indices = @transform_0, window_bounds = array<i64: 16, 128>}, {transform_indices = @transform_1, window_bounds = array<i64: 16, 128>}, {transform_indices = @transform_2, window_bounds = array<i64: 16, 128>}, {transform_indices = @transform_3, window_bounds = array<i64: 1, 8, 128>}, {transform_indices = @transform_4, window_bounds = array<i64: 1, 8, 128>}]} {
    %c0_i32 = arith.constant 0 : i32
    %0 = arith.cmpi eq, %arg1, %c0_i32 : i32
    %1 = arith.extui %0 : i1 to i32
    %c0_i32_0 = arith.constant 0 : i32
    %2 = arith.cmpi ne, %1, %c0_i32_0 : i32
    scf.if %2 {
      %cst_34 = arith.constant 0.000000e+00 : f32
      %71 = vector.broadcast %cst_34 : f32 to vector<1x8x128xf32>
      %c0_35 = arith.constant 0 : index
      %c0_36 = arith.constant 0 : index
      %c0_37 = arith.constant 0 : index
      %72 = vector.load %arg5[%c0_35, %c0_36, %c0_37] : memref<1x8x128xf32, #tpu.memory_space<vmem>>, vector<1x8x128xf32>
      tpu.vector_store %arg5[%c0_35, %c0_36, %c0_37], %71 {strides = array<i32>} : memref<1x8x128xf32, #tpu.memory_space<vmem>>, vector<1x8x128xf32>,
      %cst_38 = arith.constant 0.000000e+00 : f32
      %73 = vector.broadcast %cst_38 : f32 to vector<1x8x128xf32>
      %c0_39 = arith.constant 0 : index
      %c0_40 = arith.constant 0 : index
      %c0_41 = arith.constant 0 : index
      %74 = vector.load %arg6[%c0_39, %c0_40, %c0_41] : memref<1x8x128xf32, #tpu.memory_space<vmem>>, vector<1x8x128xf32>
      tpu.vector_store %arg6[%c0_39, %c0_40, %c0_41], %73 {strides = array<i32>} : memref<1x8x128xf32, #tpu.memory_space<vmem>>, vector<1x8x128xf32>,
    } else {
    }
    %c1_i32 = arith.constant 1 : i32
    %3 = arith.muli %arg0, %c1_i32 : i32
    %4 = arith.addi %3, %arg1 : i32
    %c16_i32 = arith.constant 16 : i32
    %5 = arith.muli %4, %c16_i32 : i32
    %c0_i32_1 = arith.constant 0 : i32
    %c16_i32_2 = arith.constant 16 : i32
    %6 = arith.muli %c0_i32_1, %c16_i32_2 : i32
    %7 = tpu.assume_multiple %6, 16 : i32
    %8 = arith.index_cast %7 : i32 to index
    %c0 = arith.constant 0 : index
    %9 = vector.load %arg2[%8, %c0] : memref<16x128xf32, #tpu.memory_space<vmem>>, vector<16x128xf32>
    %10 = arith.index_cast %7 : i32 to index
    %c0_3 = arith.constant 0 : index
    %11 = vector.load %arg3[%10, %c0_3] : memref<16x128xf32, #tpu.memory_space<vmem>>, vector<16x128xf32>
    %12 = tpu.iota {dimensions = array<i32: 0>} : vector<16x1xi32>
    %c16_i32_4 = arith.constant 16 : i32
    %13 = arith.muli %c0_i32_1, %c16_i32_4 : i32
    %14 = arith.addi %5, %13 : i32
    %15 = vector.broadcast %14 : i32 to vector<16x1xi32>
    %16 = arith.addi %12, %15 : vector<16x1xi32>
    %c16_i32_5 = arith.constant 16 : i32
    %17 = vector.broadcast %c16_i32_5 : i32 to vector<16x1xi32>
    %18 = arith.cmpi slt, %16, %17 : vector<16x1xi32>
    %cst = arith.constant 2.550000e+02 : f32
    %19 = vector.broadcast %cst : f32 to vector<16x128xf32>
    %20 = arith.cmpf one, %11, %19 : vector<16x128xf32>
    %21 = vector.broadcast %18 : vector<16x1xi1> to vector<16x128xi1>
    %22 = arith.andi %21, %20 : vector<16x128xi1>
    %cst_6 = arith.constant 5.000000e-01 : f32
    %23 = vector.broadcast %cst_6 : f32 to vector<16x128xf32>
    %24 = arith.mulf %23, %9 : vector<16x128xf32>
    %25 = math.tanh %24 : vector<16x128xf32>
    %cst_7 = arith.constant 1.000000e+00 : f32
    %26 = vector.broadcast %cst_7 : f32 to vector<16x128xf32>
    %27 = arith.addf %25, %26 : vector<16x128xf32>
    %cst_8 = arith.constant 5.000000e-01 : f32
    %28 = vector.broadcast %cst_8 : f32 to vector<16x128xf32>
    %29 = arith.mulf %28, %27 : vector<16x128xf32>
    %cst_9 = arith.constant 9.99999997E-7 : f32
    %cst_10 = arith.constant 0.999998986 : f32
    %30 = vector.broadcast %cst_9 : f32 to vector<16x128xf32>
    %31 = arith.maximumf %30, %29 : vector<16x128xf32>
    %32 = vector.broadcast %cst_10 : f32 to vector<16x128xf32>
    %33 = arith.minimumf %32, %31 : vector<16x128xf32>
    %cst_11 = arith.constant 9.99999997E-7 : f32
    %cst_12 = arith.constant 0.999998986 : f32
    %34 = vector.broadcast %cst_11 : f32 to vector<16x128xf32>
    %35 = arith.maximumf %34, %11 : vector<16x128xf32>
    %36 = vector.broadcast %cst_12 : f32 to vector<16x128xf32>
    %37 = arith.minimumf %36, %35 : vector<16x128xf32>
    %cst_13 = arith.constant 1.000000e+00 : f32
    %38 = vector.broadcast %cst_13 : f32 to vector<16x128xf32>
    %39 = arith.subf %38, %37 : vector<16x128xf32>
    %cst_14 = arith.constant 1.000000e+00 : f32
    %40 = vector.broadcast %cst_14 : f32 to vector<16x128xf32>
    %41 = arith.subf %40, %33 : vector<16x128xf32>
    %42 = arith.mulf %39, %41 : vector<16x128xf32>
    %43 = arith.mulf %37, %33 : vector<16x128xf32>
    %44 = arith.addf %42, %43 : vector<16x128xf32>
    %cst_15 = arith.constant 1.000000e+00 : f32
    %45 = vector.broadcast %cst_15 : f32 to vector<16x128xf32>
    %46 = arith.subf %45, %44 : vector<16x128xf32>
    %47 = arith.mulf %46, %46 : vector<16x128xf32>
    %cst_16 = arith.constant 0.000000e+00 : f32
    %48 = vector.broadcast %cst_16 : f32 to vector<16x128xf32>
    %49 = arith.subf %48, %47 : vector<16x128xf32>
    %50 = math.log %44 : vector<16x128xf32>
    %51 = arith.mulf %49, %50 : vector<16x128xf32>
    %52 = arith.index_cast %7 : i32 to index
    %c0_17 = arith.constant 0 : index
    %53 = vector.load %arg4[%52, %c0_17] : memref<16x128xf32, #tpu.memory_space<vmem>>, vector<16x128xf32>
    %54 = arith.mulf %51, %53 : vector<16x128xf32>
    %cst_18 = arith.constant 0.000000e+00 : f32
    %55 = vector.broadcast %cst_18 : f32 to vector<16x128xf32>
    %56 = arith.select %22, %54, %55 : vector<16x128xi1>, vector<16x128xf32>
    %57 = arith.extui %22 : vector<16x128xi1> to vector<16x128xi32>
    %58 = arith.sitofp %57 : vector<16x128xi32> to vector<16x128xf32>
    %c0_19 = arith.constant 0 : index
    %c0_20 = arith.constant 0 : index
    %c0_21 = arith.constant 0 : index
    %59 = vector.load %arg5[%c0_19, %c0_20, %c0_21] : memref<1x8x128xf32, #tpu.memory_space<vmem>>, vector<1x8x128xf32>
    %60 = vector.shape_cast %56 : vector<16x128xf32> to vector<2x8x128xf32>
    %cst_22 = arith.constant dense<0.000000e+00> : vector<8x128xf32>
    %61 = vector.multi_reduction <add>, %60, %cst_22 [0] : vector<2x8x128xf32> to vector<8x128xf32>
    %62 = vector.shape_cast %61 : vector<8x128xf32> to vector<1x8x128xf32>
    %63 = arith.addf %59, %62 : vector<1x8x128xf32>
    %c0_23 = arith.constant 0 : index
    %c0_24 = arith.constant 0 : index
    %c0_25 = arith.constant 0 : index
    %64 = vector.load %arg5[%c0_23, %c0_24, %c0_25] : memref<1x8x128xf32, #tpu.memory_space<vmem>>, vector<1x8x128xf32>
    tpu.vector_store %arg5[%c0_23, %c0_24, %c0_25], %63 {strides = array<i32>} : memref<1x8x128xf32, #tpu.memory_space<vmem>>, vector<1x8x128xf32>,
    %c0_26 = arith.constant 0 : index
    %c0_27 = arith.constant 0 : index
    %c0_28 = arith.constant 0 : index
    %65 = vector.load %arg6[%c0_26, %c0_27, %c0_28] : memref<1x8x128xf32, #tpu.memory_space<vmem>>, vector<1x8x128xf32>
    %66 = vector.shape_cast %58 : vector<16x128xf32> to vector<2x8x128xf32>
    %cst_29 = arith.constant dense<0.000000e+00> : vector<8x128xf32>
    %67 = vector.multi_reduction <add>, %66, %cst_29 [0] : vector<2x8x128xf32> to vector<8x128xf32>
    %68 = vector.shape_cast %67 : vector<8x128xf32> to vector<1x8x128xf32>
    %69 = arith.addf %65, %68 : vector<1x8x128xf32>
    %c0_30 = arith.constant 0 : index
    %c0_31 = arith.constant 0 : index
    %c0_32 = arith.constant 0 : index
    %70 = vector.load %arg6[%c0_30, %c0_31, %c0_32] : memref<1x8x128xf32, #tpu.memory_space<vmem>>, vector<1x8x128xf32>
    tpu.vector_store %arg6[%c0_30, %c0_31, %c0_32], %69 {strides = array<i32>} : memref<1x8x128xf32, #tpu.memory_space<vmem>>, vector<1x8x128xf32>,
    %c1_i32_33 = arith.constant 1 : i32
    return
  }
  func.func @transform_0(%arg0: i32, %arg1: i32) -> (i32, i32) {
    %c1_i32 = arith.constant 1 : i32
    %0 = arith.muli %arg0, %c1_i32 : i32
    %1 = arith.addi %0, %arg1 : i32
    %c0_i32 = arith.constant 0 : i32
    %c0_i32_0 = arith.constant 0 : i32
    return %1, %c0_i32 : i32, i32
  }
  func.func @transform_1(%arg0: i32, %arg1: i32) -> (i32, i32) {
    %c1_i32 = arith.constant 1 : i32
    %0 = arith.muli %arg0, %c1_i32 : i32
    %1 = arith.addi %0, %arg1 : i32
    %c0_i32 = arith.constant 0 : i32
    %c0_i32_0 = arith.constant 0 : i32
    return %1, %c0_i32 : i32, i32
  }
  func.func @transform_2(%arg0: i32, %arg1: i32) -> (i32, i32) {
    %c1_i32 = arith.constant 1 : i32
    %0 = arith.muli %arg0, %c1_i32 : i32
    %1 = arith.addi %0, %arg1 : i32
    %c0_i32 = arith.constant 0 : i32
    %c0_i32_0 = arith.constant 0 : i32
    return %1, %c0_i32 : i32, i32
  }
  func.func @transform_3(%arg0: i32, %arg1: i32) -> (i32, i32, i32) {
    %c0_i32 = arith.constant 0 : i32
    %c0_i32_0 = arith.constant 0 : i32
    %c0_i32_1 = arith.constant 0 : i32
    return %arg0, %c0_i32, %c0_i32_0 : i32, i32, i32
  }
  func.func @transform_4(%arg0: i32, %arg1: i32) -> (i32, i32, i32) {
    %c0_i32 = arith.constant 0 : i32
    %c0_i32_0 = arith.constant 0 : i32
    %c0_i32_1 = arith.constant 0 : i32
    return %arg0, %c0_i32, %c0_i32_0 : i32, i32, i32
  }
}

</mosaic_0001>

<bundles_post_ra>
// kernel: tpu_custom_call.1
= control target key start
LH: loop header
LB: loop body
LE: loop exit
PB: predicated region body
PF: predicated region fallthrough
CT: control target
= control target key end

     0   :  { %10 = vsyncpa [#allocation3], 0  ;;  %s452_s0 = inlined_call_operand.hbm [shape: f32[16,128], index: 0, kind: input, shape index: {}]   ;;  %s453_s1 = inlined_call_operand.hbm [shape: f32[16,128], index: 1, kind: input, shape index: {}]   ;;  %s454_s2 = inlined_call_operand.hbm [shape: f32[16,128], index: 2, kind: input, shape index: {}]   ;;  %s455_s3 = inlined_call_operand.hbm [shape: f32[1,8,128], index: 3, kind: output, shape index: {0}]   ;;  %s456_s4 = inlined_call_operand.hbm [shape: f32[1,8,128], index: 4, kind: output, shape index: {1}]  }
   0x1   :  { %11 = vsyncpa [#allocation6], 0 }
   0x2   :  { %12 = vsyncpa [#allocation4], 0 }
   0x3   :  { %13 = vsyncpa [#allocation10], 0  ;;  %s327_s15 = smov [#allocation5]   ;;  %s328_s17 = smov [#allocation2]  }
   0x4   :  { %s39_s16 = sshll.u32 %s327_s15, 4  ;;  %s23_s18 = sshll.u32 %s328_s17, 4  ;;  %s40_s16 = int_to_ptr.vmem [resolvable:$true] %s39_s16  ;;  %s360_s18 = int_to_ptr.vmem [resolvable:$true] %s23_s18 }
   0x5   :  { %s209_s21 = scalar_lea.hbm %s453_s1, 256 }
   0x6   :  { %p210_p0 = scmp.ne.s32.totalorder %s453_s1, %s209_s21  ;;  %p213_p1 = scmp.lt.u32.totalorder %s209_s21, %s453_s1 }
   0x8   :  { %p215_p2 = pnand %p213_p1, %p210_p0 }
   0xa   :  { %218 = shalt.err (!%p215_p2)
}
   0xb   :  { %s219_s26 = scalar_lea.vmem %s40_s16, 256  ;;  %p224_p4 = scmp.lt.s32.totalorder %s40_s16, %s40_s16 }
   0xc   :  { %p220_p3 = scmp.ne.s32.totalorder %s40_s16, %s219_s26  ;;  %p225_p5 = scmp.lt.s32.totalorder %s219_s26, %s219_s26 }
   0xe   :  { %p226_p6 = por %p225_p5, %p224_p4 }
  0x10   :  { %p227_p7 = pnand %p226_p6, %p220_p3 }
  0x12   :  { %230 = shalt.err (!%p227_p7)
}
  0x13   :  { %s329_s27 = smov 128   ;;  %s330_s28 = smov 8  }
  0x14   :  { %45 = dma.hbm_to_vmem [thread:$0]  %s453_s1, 256, %s40_s16, [#allocation6], %s329_s27, %s329_s27, %s330_s28  }
  0x15   :  { %s231_s7 = scalar_lea.hbm %s452_s0, 256 }
  0x16   :  { %p232_p8 = scmp.ne.s32.totalorder %s452_s0, %s231_s7  ;;  %p235_p9 = scmp.lt.u32.totalorder %s231_s7, %s452_s0 }
  0x18   :  { %p237_p10 = pnand %p235_p9, %p232_p8 }
  0x1a   :  { %240 = shalt.err (!%p237_p10)
}
  0x1b   :  { %s241_s12 = scalar_lea.vmem %s360_s18, 256  ;;  %p246_p12 = scmp.lt.s32.totalorder %s360_s18, %s360_s18 }
  0x1c   :  { %p242_p11 = scmp.ne.s32.totalorder %s360_s18, %s241_s12  ;;  %p247_p13 = scmp.lt.s32.totalorder %s241_s12, %s241_s12 }
  0x1e   :  { %p248_p0 = por %p247_p13, %p246_p12 }
  0x20   :  { %p249_p1 = pnand %p248_p0, %p242_p11 }
  0x22   :  { %252 = shalt.err (!%p249_p1)
}
  0x23   :  { %29 = dma.hbm_to_vmem [thread:$0]  %s452_s0, 256, %s360_s18, [#allocation3], %s329_s27, %s329_s27, %s330_s28  }
  0x24   :  { %s331_s14 = smov [#allocation7]   ;;  %s253_s19 = scalar_lea.hbm %s454_s2, 256 }
  0x25   :  { %s55_s15 = sshll.u32 %s331_s14, 4  ;;  %p254_p2 = scmp.ne.s32.totalorder %s454_s2, %s253_s19  ;;  %s56_s15 = int_to_ptr.vmem [resolvable:$true] %s55_s15 }
  0x26   :  { %p257_p3 = scmp.lt.u32.totalorder %s253_s19, %s454_s2 }
  0x28   :  { %p259_p4 = pnand %p257_p3, %p254_p2 }
  0x2a   :  { %262 = shalt.err (!%p259_p4)
}
  0x2b   :  { %s263_s24 = scalar_lea.vmem %s56_s15, 256  ;;  %p268_p6 = scmp.lt.s32.totalorder %s56_s15, %s56_s15 }
  0x2c   :  { %p264_p5 = scmp.ne.s32.totalorder %s56_s15, %s263_s24  ;;  %p269_p7 = scmp.lt.s32.totalorder %s263_s24, %s263_s24 }
  0x2e   :  { %p270_p8 = por %p269_p7, %p268_p6 }
  0x30   :  { %p271_p9 = pnand %p270_p8, %p264_p5 }
  0x32   :  { %274 = shalt.err (!%p271_p9)
}
  0x33   :  { %61 = dma.hbm_to_vmem [thread:$0]  %s454_s2, 256, %s56_s15, [#allocation6], %s329_s27, %s329_s27, %s330_s28  }
  0x34   :  { %319 = dma.done.wait [#allocation3], 256  }
  0x35   :  { %320 = vsyncadd [#allocation3], 4294967040 }
  0x36   :  { %321 = dma.done.wait [#allocation6], 512  }
  0x37   :  { %322 = vsyncadd [#allocation6], 4294966784  ;;  %v85_v0 = vld [vmem:[#allocation2] sm:$0xff]  ;;  %v86_v1 = vld [vmem:[#allocation2 + $0x8] sm:$0xff]  ;;  %v332_v6 = vmov 0.0   ;;  %s333_s2 = smov [#allocation9]  }
  0x38   :  { %v412_v2 = vld [vmem:[#allocation5] sm:$0xff]  ;;  %v414_v3 = vld [vmem:[#allocation5 + $0x8] sm:$0xff]  ;;  %v105_v4 = vmul.f32 0.5, %v85_v0  ;;  %v106_v5 = vmul.f32 0.5, %v86_v1  ;;  %s177_s25 = sshll.u32 %s333_s2, 4  ;;  %s178_s25 = int_to_ptr.vmem [resolvable:$true] %s177_s25 }
  0x39   :  { %vm97_vm0 = vcmp.ne.f32.partialorder %v412_v2, 255.0  ;;  %vm98_vm1 = vcmp.ne.f32.partialorder %v414_v3, 255.0  ;;  %s275_s26 = scalar_lea.vmem %s178_s25, 128  ;;  %p280_p11 = scmp.lt.s32.totalorder %s178_s25, %s178_s25 }
  0x3a   :  { %v191_v7 = vsel %vm97_vm0, 1.0, %v332_v6  ;;  %201 = vtanh.f32 %v105_v4  ;;  %v192_v8 = vsel %vm98_vm1, 1.0, %v332_v6  ;;  %p276_p10 = scmp.ne.s32.totalorder %s178_s25, %s275_s26  ;;  %p281_p12 = scmp.lt.s32.totalorder %s275_s26, %s275_s26 }
  0x3b   :  { %203 = vtanh.f32 %v106_v5  ;;  %v158_v9 = vadd.f32 %v192_v8, %v191_v7 }
  0x3c   :  { %p282_p13 = por %p281_p12, %p280_p11 }
  0x3d   :  { %160 = vst [vmem:[#allocation9] sm:$0xff] %v158_v9 }
  0x3e   :  { %p283_p0 = pnand %p282_p13, %p276_p10 }
  0x40   :  { %286 = shalt.err (!%p283_p0)
}
  0x41   :  { %s287_s29 = scalar_lea.hbm %s456_s4, 128 }
  0x42   :  { %p288_p1 = scmp.ne.s32.totalorder %s456_s4, %s287_s29  ;;  %p291_p2 = scmp.lt.u32.totalorder %s287_s29, %s456_s4 }
  0x44   :  { %p293_p3 = pnand %p291_p2, %p288_p1 }
  0x46   :  { %296 = shalt.err (!%p293_p3)
}
  0x47   :  { %180 = dma.vmem_to_hbm [thread:$0]  %s178_s25, 128, %s456_s4, [#allocation10]   ;;  %v117_v10 = vmax.f32 %v412_v2, 1e-06  ;;  %v202_v11 = vpop.eup %201  ;;  %v118_v12 = vmax.f32 %v414_v3, 1e-06 }
  0x48   :  { %v204_v13 = vpop.eup %203  ;;  %v109_v14 = vadd.f32 1.0, %v202_v11  ;;  %v143_v44 = vld [vmem:[#allocation7] sm:$0xff]  ;;  %v144_v46 = vld [vmem:[#allocation7 + $0x8] sm:$0xff]  ;;  %s334_s4 = smov [#allocation8]  }
  0x49   :  { %v110_v15 = vadd.f32 1.0, %v204_v13  ;;  %v119_v17 = vmin.f32 %v117_v10, 0.999999  ;;  %v120_v19 = vmin.f32 %v118_v12, 0.999999  ;;  %s167_s10 = sshll.u32 %s334_s4, 4  ;;  %s168_s10 = int_to_ptr.vmem [resolvable:$true] %s167_s10 }
  0x4a   :  { %v111_v16 = vmul.f32 0.5, %v109_v14  ;;  %s297_s11 = scalar_lea.vmem %s168_s10, 128  ;;  %p302_p5 = scmp.lt.s32.totalorder %s168_s10, %s168_s10 }
  0x4b   :  { %v112_v18 = vmul.f32 0.5, %v110_v15  ;;  %v121_v23 = vsub.f32 1.0, %v119_v17  ;;  %v122_v25 = vsub.f32 1.0, %v120_v19  ;;  %p298_p4 = scmp.ne.s32.totalorder %s168_s10, %s297_s11  ;;  %p303_p6 = scmp.lt.s32.totalorder %s297_s11, %s297_s11 }
  0x4c   :  { %v113_v20 = vmax.f32 %v111_v16, 1e-06 }
  0x4d   :  { %v114_v21 = vmax.f32 %v112_v18, 1e-06  ;;  %p304_p7 = por %p303_p6, %p302_p5 }
  0x4e   :  { %v115_v22 = vmin.f32 %v113_v20, 0.999999 }
  0x4f   :  { %v116_v24 = vmin.f32 %v114_v21, 0.999999  ;;  %p305_p8 = pnand %p304_p7, %p298_p4 }
  0x50   :  { %v123_v26 = vsub.f32 1.0, %v115_v22  ;;  %v127_v27 = vmul.f32 %v119_v17, %v115_v22 }
  0x51   :  { %v124_v28 = vsub.f32 1.0, %v116_v24  ;;  %v128_v29 = vmul.f32 %v120_v19, %v116_v24 }
  0x52   :  { %v125_v30 = vmul.f32 %v123_v26, %v121_v23 }
  0x53   :  { %v126_v31 = vmul.f32 %v124_v28, %v122_v25 }
  0x54   :  { %v129_v32 = vadd.f32 %v127_v27, %v125_v30 }
  0x55   :  { %v130_v33 = vadd.f32 %v128_v29, %v126_v31 }
  0x56   :  { %205 = vlog2.f32 %v129_v32  ;;  %v131_v34 = vsub.f32 1.0, %v129_v32 }
  0x57   :  { %207 = vlog2.f32 %v130_v33  ;;  %v132_v35 = vsub.f32 1.0, %v130_v33 }
  0x58   :  { %v133_v36 = vmul.f32 %v131_v34, %v131_v34 }
  0x59   :  { %v134_v37 = vmul.f32 %v132_v35, %v132_v35 }
  0x5a   :  { %v135_v38 = vsub.f32 0.0, %v133_v36 }
  0x5b   :  { %v136_v40 = vsub.f32 0.0, %v134_v37 }
  0x60   :  { %v206_v39 = vpop.eup %205 }
  0x61   :  { %v208_v41 = vpop.eup %207  ;;  %v138_v42 = vmul.f32 0.6931472, %v206_v39 }
  0x62   :  { %v140_v43 = vmul.f32 0.6931472, %v208_v41 }
  0x63   :  { %v141_v45 = vmul.f32 %v138_v42, %v135_v38 }
  0x64   :  { %v142_v47 = vmul.f32 %v140_v43, %v136_v40 }
  0x65   :  { %v145_v48 = vmul.f32 %v143_v44, %v141_v45 }
  0x66   :  { %v146_v49 = vmul.f32 %v144_v46, %v142_v47 }
  0x67   :  { %v147_v50 = vsel %vm97_vm0, %v145_v48, 0.0 }
  0x68   :  { %v148_v51 = vsel %vm98_vm1, %v146_v49, 0.0 }
  0x69   :  { %v154_v52 = vadd.f32 %v148_v51, %v147_v50 }
  0x6b   :  { %156 = vst [vmem:[#allocation8] sm:$0xff] %v154_v52 }
  0x6c   :  { %308 = shalt.err (!%p305_p8)
}
  0x6d   :  { %s309_s13 = scalar_lea.hbm %s455_s3, 128 }
  0x6e   :  { %p310_p9 = scmp.ne.s32.totalorder %s455_s3, %s309_s13  ;;  %p313_p10 = scmp.lt.u32.totalorder %s309_s13, %s455_s3 }
  0x70   :  { %p315_p11 = pnand %p313_p10, %p310_p9 }
  0x72   :  { %318 = shalt.err (!%p315_p11)
}
  0x73   :  { %170 = dma.vmem_to_hbm [thread:$0]  %s168_s10, 128, %s455_s3, [#allocation4]  }
  0x74   :  { %323 = dma.done.wait [#allocation4], 128  }
  0x75   :  { %324 = vsyncadd [#allocation4], 4294967168 }
  0x76   :  { %325 = dma.done.wait [#allocation10], 128  }
  0x77   :  { %326 = vsyncadd [#allocation10], 4294967168 }
  0x78   :  { %187 = vsyncpa [#allocation3], 1 }
  0x79   :  { %188 = vsyncpa [#allocation6], 1 }
  0x7a   :  { %189 = vsyncpa [#allocation4], 1 }
  0x7b   :  { %190 = vsyncpa [#allocation10], 1 }

</bundles_post_ra>
